<compile_context>
chip_gen: v7x
topology: tpu7x:2x2x1
jax: 0.10.0
libtpu: 0.0.40
codegen_flags: <defaults>
</compile_context>

<pallas_src>
import math
from functools import partial

import jax
import jax.numpy as jnp
from jax.experimental import pallas as pl
from jax.experimental.pallas import tpu as pltpu

_MIB = 1024 * 1024


# --------------------------------------------------------------------------------------------------
# Buffer setup (identical math to the PyTorch __init__); done once, pre-cast to the model dtype.
# --------------------------------------------------------------------------------------------------
def _build_pe(d_model: int, max_len: int, dtype=jnp.float32) -> jnp.ndarray:
    assert d_model % 2 == 0, "PositionalEncoding requires an even dModel (same as the PyTorch recipe)"
    position = jnp.arange(0, max_len, dtype=jnp.float32)[:, None]                 # (maxLen, 1)
    denominator = jnp.exp(
        jnp.arange(0, d_model, 2, dtype=jnp.float32) * (math.log(10000.0) / d_model)
    )                                                                              # (d_model/2,)
    pe = jnp.zeros((max_len, d_model), dtype=jnp.float32)
    pe = pe.at[:, 0::2].set(jnp.sin(position / denominator))
    pe = pe.at[:, 1::2].set(jnp.cos(position / denominator))
    return pe.astype(dtype)                            # cast hoisted out of the forward path


# --------------------------------------------------------------------------------------------------
# Small helpers
# --------------------------------------------------------------------------------------------------
def _round_up(x: int, m: int) -> int:
    return ((x + m - 1) // m) * m


def _sublane_packing(dtype) -> int:
    """Rows per packed sublane group: 8 for 32-bit, 16 for bf16/fp16, 32 for int8/fp8."""
    itemsize = jnp.dtype(dtype).itemsize
    return 8 * max(1, 4 // max(1, itemsize))


def _default_block_bytes() -> int:
    """Per-block (single buffer) byte budget, per TPU generation."""
    try:
        kind = jax.devices()[0].device_kind.lower()
    except Exception:
        return 2 * _MIB
    if "v7" in kind:
        return 5 * _MIB        # v7x: bigger blocks amortize per-grid-step overhead vs ~3.2 TB/s HBM
    if "v6" in kind:
        return 3 * _MIB
    return 2 * _MIB            # v5e scoped-VMEM default is only 16 MiB — stay modest


def _is_v7() -> bool:
    try:
        return "v7" in jax.devices()[0].device_kind.lower()
    except Exception:
        return False


def _choose_tiles(T, B, D, itemsize, packing, block_bytes, want_two_t_blocks):
    """Pick (tile_t, tile_bd, slice_pe) for the 2-D (T, B*D) slab view."""
    BD = B * D
    # ---- lane (B*D) tile: full row if it fits, otherwise a multiple of lcm(D, 128) so it is both
    #      128-lane aligned (layout rule) and a whole number of batch elements (pe repeats cleanly).
    if packing * BD * itemsize <= block_bytes:
        tile_bd = BD
    else:
        unit = (D * 128) // math.gcd(D, 128)
        units = max(1, block_bytes // (packing * unit * itemsize))
        tile_bd = min(BD, units * unit)
    # ---- T tile: as many packing-rounded rows as fit the budget.
    rows = max(packing, (block_bytes // max(1, tile_bd * itemsize)) // packing * packing)
    if T % packing == 0:
        tile_t, slice_pe = min(rows, T), False
    elif T > packing:
        tile_t, slice_pe = min(rows, (T // packing) * packing), False   # ragged last T block (masked)
    else:
        tile_t, slice_pe = T, True           # tiny T: one full-extent block; pe sliced to (T, D)
    if want_two_t_blocks and tile_t >= T and T > packing:
        tile_t = min(tile_t, max(packing, _round_up(pl.cdiv(T, 2), packing)))   # give each TC a block
    return tile_t, tile_bd, slice_pe


# --------------------------------------------------------------------------------------------------
# Kernel
# --------------------------------------------------------------------------------------------------
def _lane_tile(block, reps: int, d: int):
    """Tile a (t, d) block `reps` times along the lane axis with a log-depth concat chain."""
    if reps == 1:
        return block
    out, filled = block, 1
    while filled * 2 <= reps:
        out = jnp.concatenate([out, out], axis=-1)
        filled *= 2
    if filled < reps:
        out = jnp.concatenate([out, out[:, : (reps - filled) * d]], axis=-1)
    return out


def _pos_enc_kernel(x_ref, pe_ref, o_ref, *, reps: int, d: int):
    # x_ref / o_ref: (tile_t, tile_bd);  pe_ref: (tile_t, d);  tile_bd == reps * d.
    pe_row = _lane_tile(pe_ref[...], reps, d)          # in-VMEM broadcast over batch (lane axis)
    o_ref[...] = (x_ref[...] + pe_row).astype(o_ref.dtype)


# --------------------------------------------------------------------------------------------------
# Forward wrapper
# --------------------------------------------------------------------------------------------------
def positional_encoding(
    input_batch: jnp.ndarray,
    pe: jnp.ndarray,
    *,
    tile_t: int | None = None,
    target_block_bytes: int | None = None,
    use_core_parallel: bool | None = None,   # None = auto (enabled on v7x only)
    donate_input: bool = False,
) -> jnp.ndarray:
    """input_batch: (T, B, D); pe: (maxLen, D). Returns input + pe[:T] broadcast over B."""
    T, B, D = input_batch.shape
    max_len, d_pe = pe.shape
    assert d_pe == D and max_len >= T, "pe buffer too small for the input"
    if pe.dtype != input_batch.dtype:        # normally a no-op: pe is pre-cast at init
        pe = pe.astype(input_batch.dtype)

    itemsize = jnp.dtype(input_batch.dtype).itemsize
    packing = _sublane_packing(input_batch.dtype)
    if target_block_bytes is None:
        target_block_bytes = _default_block_bytes()
    if use_core_parallel is None:
        use_core_parallel = _is_v7()

    BD = B * D
    auto_tile_t, tile_bd, slice_pe = _choose_tiles(
        T, B, D, itemsize, packing, int(target_block_bytes), want_two_t_blocks=use_core_parallel)
    if tile_t is None:
        tile_t = auto_tile_t
    else:
        tile_t = max(1, min(int(tile_t), _round_up(T, packing)))
        if not slice_pe:
            tile_t = max(packing, (tile_t // packing) * packing)

    grid_t = pl.cdiv(T, tile_t)
    grid_bd = pl.cdiv(BD, tile_bd)
    reps = tile_bd // D

    pe_in = pe[:T] if slice_pe else pe                 # slice only in the tiny-T corner case
    x2d = input_batch.reshape(T, BD)                   # free view of a contiguous (T, B, D) array

    # VMEM limit sized to the actual double-buffered blocks (+ in-kernel lane-tiled pe temp).
    blk_x = tile_t * tile_bd * itemsize
    blk_pe = tile_t * D * itemsize
    needed = 2 * (2 * blk_x + blk_pe) + blk_x
    vmem_limit = int(min(64 * _MIB, max(16 * _MIB, 2 * needed)))

    cost = pl.CostEstimate(
        flops=int(x2d.size),
        transcendentals=0,
        bytes_accessed=int(2 * x2d.size * itemsize + T * D * itemsize),
    )

    kernel = partial(_pos_enc_kernel, reps=reps, d=D)
    out_shape = jax.ShapeDtypeStruct((T, BD), input_batch.dtype)
    in_specs = [
        pl.BlockSpec((tile_t, tile_bd), lambda i, j: (i, j)),   # x slab: dense lanes, unmasked stores
        pl.BlockSpec((tile_t, D), lambda i, j: (i, 0)),         # pe rows for this T tile (tiny DMA)
    ]
    out_spec = pl.BlockSpec((tile_t, tile_bd), lambda i, j: (i, j))
    aliases = {0: 0} if donate_input else {}
    core_par = getattr(pltpu, "CORE_PARALLEL", pltpu.PARALLEL)

    def build(t_sem):
        return pl.pallas_call(
            kernel,
            out_shape=out_shape,
            grid=(grid_t, grid_bd),
            in_specs=in_specs,
            out_specs=out_spec,
            compiler_params=pltpu.CompilerParams(
                dimension_semantics=(t_sem, pltpu.PARALLEL),
                vmem_limit_bytes=vmem_limit,
            ),
            cost_estimate=cost,
            input_output_aliases=aliases,
        )

    if use_core_parallel and grid_t >= 2:
        try:
            out2d = build(core_par)(x2d, pe_in)
        except Exception:
            out2d = build(pltpu.PARALLEL)(x2d, pe_in)   # safe fallback if core-parallel is rejected
    else:
        out2d = build(pltpu.PARALLEL)(x2d, pe_in)

    return out2d.reshape(T, B, D)


# --------------------------------------------------------------------------------------------------
# Tests
# --------------------------------------------------------------------------------------------------
if __name__ == "__main__":
    d_model, max_len = 32, 64
    T, B = 48, 2

    pe = _build_pe(d_model, max_len)                       # built & pre-cast once (init-time)
    key = jax.random.PRNGKey(0)
    x = jax.random.normal(key, (T, B, d_model), dtype=jnp.float32)
    ref = x + pe[:T][:, None, :]

    # 1) Forced small tile -> multi-step pipelined grid (3, 1).
    out = jax.block_until_ready(positional_encoding(x, pe, tile_t=16))
    assert out.shape == (T, B, d_model)
    assert jnp.allclose(out, ref, atol=1e-6), "mismatch vs reference (forced tile)"

    # 2) Auto-sized tiling path.
    out2 = jax.block_until_ready(positional_encoding(x, pe))
    assert jnp.allclose(out2, ref, atol=1e-6), "mismatch vs reference (auto tile)"

    # 3) bf16 path (packing = 16 rows).
    pe_bf = pe.astype(jnp.bfloat16)
    x_bf = x.astype(jnp.bfloat16)
    out_bf = jax.block_until_ready(positional_encoding(x_bf, pe_bf))
    ref_bf = x_bf.astype(jnp.float32) + pe_bf.astype(jnp.float32)[:T][:, None, :]
    assert jnp.allclose(out_bf.astype(jnp.float32), ref_bf, atol=5e-2), "mismatch vs reference (bf16)"

    # 4) Ragged T (last block partially out of bounds, masked stores).
    Tr = 44
    xr = x[:Tr]
    out_r = jax.block_until_ready(positional_encoding(xr, pe, tile_t=16))
    ref_r = xr + pe[:Tr][:, None, :]
    assert jnp.allclose(out_r, ref_r, atol=1e-6), "mismatch vs reference (ragged T)"

    # 5) Large-row guard: tiny block budget forces a second grid axis over B*D (grid_bd > 1).
    d_model2 = 128
    pe2 = _build_pe(d_model2, max_len)
    x2 = jax.random.normal(jax.random.PRNGKey(0), (T, 4, d_model2), dtype=jnp.float32)
    out_bd = jax.block_until_ready(positional_encoding(x2, pe2, target_block_bytes=8192))
    ref_bd = x2 + pe2[:T][:, None, :]
    assert jnp.allclose(out_bd, ref_bd, atol=1e-6), "mismatch vs reference (BD-tiled)"

    print("KERNEL_OK")
</pallas_src>

<mosaic_0001>
module attributes {stable_mosaic.version = 11 : i64} {
  func.func @_pos_enc_kernel(%arg0: i32, %arg1: i32, %arg2: memref<16x64xf32, #tpu.memory_space<vmem>>, %arg3: memref<16x32xf32, #tpu.memory_space<vmem>>, %arg4: memref<16x64xf32, #tpu.memory_space<vmem>>) attributes {dimension_semantics = [#tpu.dimension_semantics<parallel>, #tpu.dimension_semantics<parallel>], iteration_bounds = array<i64: 3, 1>, scalar_prefetch = 0 : i64, scratch_operands = 0 : i64, tpu.core_type = #tpu.core_type<tc>, window_params = [{transform_indices = @transform_0, window_bounds = array<i64: 16, 64>}, {transform_indices = @transform_1, window_bounds = array<i64: 16, 32>}, {transform_indices = @transform_2, window_bounds = array<i64: 16, 64>}]} {
    %c0 = arith.constant 0 : index
    %c0_0 = arith.constant 0 : index
    %0 = vector.load %arg3[%c0, %c0_0] : memref<16x32xf32, #tpu.memory_space<vmem>>, vector<16x32xf32>
    %1 = tpu.concatenate %0, %0 in 1 : vector<16x32xf32>, vector<16x32xf32> -> vector<16x64xf32>
    %c0_1 = arith.constant 0 : index
    %c0_2 = arith.constant 0 : index
    %2 = vector.load %arg2[%c0_1, %c0_2] : memref<16x64xf32, #tpu.memory_space<vmem>>, vector<16x64xf32>
    %3 = arith.addf %2, %1 : vector<16x64xf32>
    %c0_3 = arith.constant 0 : index
    %c0_4 = arith.constant 0 : index
    %4 = vector.load %arg4[%c0_3, %c0_4] : memref<16x64xf32, #tpu.memory_space<vmem>>, vector<16x64xf32>
    tpu.vector_store %arg4[%c0_3, %c0_4], %3 {strides = array<i32>} : memref<16x64xf32, #tpu.memory_space<vmem>>, vector<16x64xf32>,
    return
  }
  func.func @transform_0(%arg0: i32, %arg1: i32) -> (i32, i32) {
    %c0_i32 = arith.constant 0 : i32
    return %arg0, %arg1 : i32, i32
  }
  func.func @transform_1(%arg0: i32, %arg1: i32) -> (i32, i32) {
    %c0_i32 = arith.constant 0 : i32
    %c0_i32_0 = arith.constant 0 : i32
    return %arg0, %c0_i32 : i32, i32
  }
  func.func @transform_2(%arg0: i32, %arg1: i32) -> (i32, i32) {
    %c0_i32 = arith.constant 0 : i32
    return %arg0, %arg1 : i32, i32
  }
}

</mosaic_0001>

<bundles_post_ra>
// kernel: tpu_custom_call.1
= control target key start
LH: loop header
LB: loop body
LE: loop exit
PB: predicated region body
PF: predicated region fallthrough
CT: control target
= control target key end

     0   :  { %7 = vsyncpa [#allocation3], 0  ;;  %s604_s0 = inlined_call_operand.vmem [shape: f32[48,64], index: 0, kind: input, shape index: {}]   ;;  %s605_s1 = inlined_call_operand.vmem [shape: f32[64,32], index: 1, kind: input, shape index: {}]   ;;  %s606_s2 = inlined_call_operand.hbm [shape: f32[48,64], index: 2, kind: output, shape index: {}]  }
   0x1   :  { %9 = vsyncpa [#allocation3 + $0x1], 0  ;;  %s487_s9 = smov 0   ;;  %s489_s10 = smov 0  }
   0x2   :  { %s491_s11 = smov 0   ;;  %s493_s12 = smov 0  }
   0x3   :  { %s495_s13 = smov 0   ;;  %s497_s14 = smov 0  }
   0x4 LB: > { %s314_s15 = sadd.s32 4294967295, %s466_s14   ;;  %s315_s16 = sadd.s32 4294967294, %s466_s14   ;;  %s466_s14 = sphi %s497_s14, %s15_s14   ;;  %s462_s13 = sphi %s495_s13, %s613_s13   ;;  %s458_s12 = sphi %s493_s12, %s612_s12   ;;  %s454_s11 = sphi %s491_s11, %s611_s11   ;;  %s450_s10 = sphi %s489_s10, %s610_s10   ;;  %s446_s9 = sphi %s487_s9, %s609_s9  }
   0x5   : > { %s27_s17 = sadd.s32 1, %s462_s13  ;;  %s90_s18 = sadd.s32 1, %s454_s11 }
   0x6   : > { %p29_p0 = scmp.ge.s32.totalorder %s27_s17, 3  ;;  %p100_p1 = scmp.ne.s32.totalorder %s454_s11, %s450_s10 }
   0x7   : > { %p101_p2 = scmp.eq.s32.totalorder %s314_s15, 2  ;;  %p106_p3 = scmp.ne.s32.totalorder %s450_s10, %s446_s9 }
   0x8   : > { %s615_s17 = smov (%p29_p0, %s27_s17), 0  ;;  %p107_p5 = scmp.eq.s32.totalorder %s315_s16, 2 }
   0x9   : > { %p527_p4 = por %p101_p2, %p100_p1  ;;  %s85_s20 = ssub.s32 %s462_s13, %s615_s17 }
   0xa   : > { %p318_p6 = scmp.ge.s32.totalorder %s466_s14, 1  ;;  %p88_p7 = scmp.eq.s32.totalorder %s85_s20, 0 }
   0xb   : > { %p534_p8 = por %p107_p5, %p106_p3  ;;  %p146_p9 = scmp.lt.s32.totalorder %s466_s14, 4 }
   0xc   : > { %s540_s22 = scalar_select %p88_p7, %s454_s11, %s90_s18  }
   0xd   : > { %p147_p10 = pnand %p318_p6, %p146_p9 }
   0xe   : > { %s320_s23 = sshll.u32 (!%p147_p10), %s458_s12, 1  ;;  %s468_s29 = smov (!%p147_p10), 32   ;;  %vm202_vm0 = vcmask (!%p147_p10), 261120   ;;  %vm209_vm1 = vcmask (!%p147_p10), 523264  }
   0xf   : > { %150 = sbr.rel (%p147_p10) target bundleno = 164 (0xa4), region = 28  ;;  %p186_p11 = scmp.lt.s32.totalorder (!%p147_p10), %s320_s23, 7 }
  0x10   : > { %p177_p12 = scmp.lt.s32.totalorder (!%p147_p10), %s320_s23, 5  ;;  %s173_s3 = sand.u32 (!%p147_p10), 1, %s450_s10  }
  0x11   : > { %s319_s7 = sshll.u32 (!%p147_p10), %s173_s3, 4  ;;  %s329_s16 = sshll.u32 (!%p147_p10), %s458_s12, 8 }
  0x12   : > { %s175_s8 = scalar_lea.vmem (!%p147_p10), [#allocation2], %s319_s7  ;;  %s469_s12 = smov (!%p147_p10), [#allocation2]  }
  0x13   : > { %s227_s15 = sshll.u32 (!%p147_p10), %s175_s8, 4  ;;  %s392_s26 = sshll.u32 (!%p147_p10), %s469_s12, 4  ;;  %s556_s15 = int_to_ptr.vmem [resolvable:$true] %s227_s15  ;;  %s393_s26 = int_to_ptr.vmem [resolvable:$false] %s392_s26 }
  0x14   : > { %s394_s27 = scalar_lea.vmem (!%p147_p10), %s393_s26, 512  ;;  %p395_p2 = scmp.lt.s32.totalorder (!%p147_p10), %s556_s15, %s393_s26 }
  0x16   : > { %s187_s24 = scalar_select %p186_p11, %s320_s23, 7 }
  0x17   : > { %s617_s23 = smov (!%p177_p12, %s320_s23), 5 }
  0x18   : > { %s323_s25 = sshll.u32 %s187_s24, 3  ;;  %s321_s30 = sshll.u32 %s617_s23, 3 }
  0x19   : > { %s189_s28 = scalar_lea.vmem %s605_s1, %s323_s25  ;;  %s183_s6 = scalar_lea.vmem %s604_s0, %s321_s30 }
  0x1a   : > { %v192_v0 = vld [vmem:[%s189_s28] sm:$0xff]  ;;  %v193_v1 = vld [vmem:[%s189_s28 + $0x8] sm:$0xff]  ;;  %s554_s23 = scalar_lea.hbm %s606_s2, %s329_s16  ;;  %s558_s24 = scalar_lea.sflag [#allocation3], %s173_s3 }
  0x1b   : > { %196 = vrot.lane.b32.xlu0 %v192_v0, %s468_s29  ;;  %v205_v2 = vld [vmem:[%s183_s6] sm:$0xff]  ;;  %v206_v6 = vld [vmem:[%s183_s6 + $0x8] sm:$0xff]  ;;  %s388_s25 = scalar_lea.vmem %s556_s15, 256 }
  0x1c   : > { %p389_p13 = scmp.ne.s32.totalorder %s556_s15, %s388_s25  ;;  %p396_p3 = scmp.lt.s32.totalorder %s394_s27, %s388_s25 }
  0x1e   : > { %p390_p0 = pnand %p389_p13, %p527_p4  ;;  %p397_p5 = por %p396_p3, %p395_p2 }
  0x1f   : > { %198 = vrot.lane.b32.xlu0 %v193_v1, %s468_s29 }
  0x20   : > { %p391_p1 = pneg %p390_p0 }
  0x22   : > { %p398_p6 = pnand %p397_p5, %p391_p1 }
  0x8d   : > { %v197_v3 = vpop.permute.xlu0 %196 }
  0x8e   : > { %v203_v4 = vsel %vm202_vm0, %v192_v0, %v197_v3 }
  0x8f   : > { %v207_v5 = vadd.f32 %v205_v2, %v203_v4 }
  0x91   : > { %210 = vst.msk [vmem:[%s175_s8] sm:$0xff] %vm209_vm1, %v207_v5  ;;  %v199_v7 = vpop.permute.xlu0 %198 }
  0x92   : > { %v204_v8 = vsel %vm202_vm0, %v193_v1, %v199_v7 }
  0x93   : > { %v208_v9 = vadd.f32 %v206_v6, %v204_v8 }
  0x95   : > { %211 = vst.msk [vmem:[%s175_s8 + $0x8] sm:$0xff] %vm209_vm1, %v208_v9 }
  0x96   : > { %401 = shalt.err (!%p398_p6)
}
  0x97   : > { %s402_s28 = scalar_lea.hbm %s554_s23, 256  ;;  %s406_s3 = scalar_lea.hbm %s606_s2, 768 }
  0x98   : > { %p403_p7 = scmp.ne.s32.totalorder %s554_s23, %s402_s28  ;;  %p407_p11 = scmp.lt.u32.totalorder %s554_s23, %s606_s2 }
  0x99   : > { %p408_p12 = scmp.lt.u32.totalorder %s406_s3, %s402_s28  ;;  %p410_p0 = scmp.lt.u32.totalorder %s402_s28, %s554_s23 }
  0x9a   : > { %p404_p9 = pnand %p403_p7, %p527_p4 }
  0x9b   : > { %p409_p13 = por %p408_p12, %p407_p11 }
  0x9c   : > { %p405_p10 = pneg %p404_p9 }
  0x9d   : > { %p411_p1 = por %p410_p0, %p409_p13 }
  0x9f   : > { %p412_p2 = pnand %p411_p1, %p405_p10 }
  0xa1   : > { %415 = shalt.err (!%p412_p2)
}
  0xa2   : > { %s470_s6 = smov 128   ;;  %s471_s7 = smov 8  }
  0xa3   : > { %330 = dma.vmem_to_hbm [thread:$0]  (%p527_p4), %s556_s15, 256, %s554_s23, %s558_s24, %s470_s6, %s470_s6, %s471_s7  }
  0xa4 PF: > { %p336_p3 = scmp.ge.s32.totalorder %s466_s14, 2  ;;  %s242_s8 = sand.u32 1, %s446_s9  }
  0xa5   : > { %s243_s16 = scalar_lea.sflag [#allocation3], %s242_s8 }
  0xa6   : > { %p333_p5 = pnand %p336_p3, %p534_p8 }
  0xa8   : > { %441 = dma.done.wait (!%p333_p5), %s243_s16, 256  }
  0xa9   : > { %443 = vsyncadd (!%p333_p5), %s243_s16, 4294967040  ;;  %s15_s14 = sadd.s32 1, %s466_s14   ;;  %s609_s9 = smov %s450_s10 }
  0xaa   : > { %p12_p6 = scmp.ge.s32.totalorder %s15_s14, 5   ;;  %s610_s10 = smov %s454_s11 }
  0xab   : > { %s611_s11 = smov %s540_s22  ;;  %s612_s12 = smov %s462_s13 }
  0xac   : > { %s613_s13 = smov %s615_s17  ;;  %14 = sbr.rel (!%p12_p6) target bundleno = 4 (0x4), region = 66 }
  0xb3   :  { %248 = vsyncpa [#allocation3], 1 }
  0xb4   :  { %250 = vsyncpa [#allocation3 + $0x1], 1 }

</bundles_post_ra>
